<compile_context>
chip_gen: v7x
topology: tpu7x:2x2x1
jax: 0.10.0
libtpu: 0.0.40
codegen_flags: <defaults>
</compile_context>

<pallas_src>
import jax
import jax.numpy as jnp
from jax.experimental import pallas as pl
from jax.experimental.pallas import tpu as pltpu


def _round_up(n, m):
    return ((n + m - 1) // m) * m


def _crossnet_kernel(num_layers, compute_dtype):
    def kernel(x0_ref, vt_ref, wt_ref, b_ref, out_ref):
        x0 = x0_ref[...].astype(jnp.float32)              # (TB, F)
        x_l = x0
        # num_layers is small & static -> unrolled Python loop (serial chain).
        for layer in range(num_layers):
            vt = vt_ref[layer]                            # (F, R), compute_dtype
            wt = wt_ref[layer]                            # (R, F), compute_dtype
            b = b_ref[layer]                              # (1, F), f32
            x_l_v = jnp.dot(x_l.astype(compute_dtype), vt,
                            preferred_element_type=jnp.float32)        # (TB, R)
            x_l_w = jnp.dot(x_l_v.astype(compute_dtype), wt,
                            preferred_element_type=jnp.float32) + b    # (TB, F)
            x_l = x0 * x_l_w + x_l                        # elementwise in f32
        out_ref[...] = x_l.astype(out_ref.dtype)
    return kernel


def low_rank_crossnet(x, V, W, bias, *, batch_tile=256, matmul_dtype=jnp.float32):
    """x: (B, F); V: (L, R, F); W: (L, F, R); bias: (L, F). Returns (B, F).

    batch_tile: MXU M-tile (128 good for v5e, 256-512 for v6e/v7x).
    matmul_dtype: operand dtype for the two dots (jnp.bfloat16 on v6e/v7x for
                  ~2-3x MXU throughput; accumulation stays f32 either way).
    """
    B, F = x.shape
    L, R, _ = V.shape

    # Lane-dense F (multiple of 128) and sublane/tile-aligned B.
    F_pad = _round_up(F, 128)
    tile = max(8, min(int(batch_tile), _round_up(B, 8)))
    tile = _round_up(tile, 8)
    B_pad = _round_up(B, tile)

    # Pre-transpose so the kernel does plain row-major matmuls.
    Vt = jnp.transpose(V, (0, 2, 1))                      # (L, F, R)
    Wt = jnp.transpose(W, (0, 2, 1))                      # (L, R, F)
    b2 = bias.reshape(L, 1, F)                            # (L, 1, F)

    if F_pad != F:
        # Zero-padding keeps the padded output columns exactly zero through
        # every layer (padded V rows / W cols / bias entries are zero).
        Vt = jnp.pad(Vt, ((0, 0), (0, F_pad - F), (0, 0)))
        Wt = jnp.pad(Wt, ((0, 0), (0, 0), (0, F_pad - F)))
        b2 = jnp.pad(b2, ((0, 0), (0, 0), (0, F_pad - F)))
    x_p = x
    if B_pad != B or F_pad != F:
        x_p = jnp.pad(x, ((0, B_pad - B), (0, F_pad - F)))

    # Weights in the matmul operand dtype (halves their VMEM/HBM cost for bf16);
    # bias stays f32 because the add happens in the f32 elementwise path.
    Vt = Vt.astype(matmul_dtype)
    Wt = Wt.astype(matmul_dtype)
    b2 = b2.astype(jnp.float32)

    grid = (B_pad // tile,)

    # VMEM budget: double-buffered x/out tiles + single-buffered weights + slack.
    w_bytes = jnp.dtype(matmul_dtype).itemsize
    io_bytes = 2 * 2 * tile * F_pad * 4
    weight_bytes = L * (F_pad * R + R * F_pad) * w_bytes + L * F_pad * 4
    scratch_bytes = 4 * tile * F_pad * 4
    vmem_limit = int(min(64 * 1024 * 1024,
                         io_bytes + weight_bytes + scratch_bytes + (8 << 20)))

    flops = L * (4 * B_pad * F_pad * R + 3 * B_pad * F_pad)
    bytes_accessed = 2 * B_pad * F_pad * 4 + weight_bytes
    cost = pl.CostEstimate(flops=flops, transcendentals=0,
                           bytes_accessed=bytes_accessed)

    out = pl.pallas_call(
        _crossnet_kernel(L, matmul_dtype),
        out_shape=jax.ShapeDtypeStruct((B_pad, F_pad), x.dtype),
        grid_spec=pltpu.PrefetchScalarGridSpec(
            num_scalar_prefetch=0,
            grid=grid,
            in_specs=[
                # Batch tile of x0 (double-buffered by default).
                pl.BlockSpec((tile, F_pad), lambda i: (i, 0)),
                # Grid-invariant weights/bias: single-buffered to save VMEM.
                pl.BlockSpec((L, F_pad, R), lambda i: (0, 0, 0),
                             pipeline_mode=pl.Buffered(1)),
                pl.BlockSpec((L, R, F_pad), lambda i: (0, 0, 0),
                             pipeline_mode=pl.Buffered(1)),
                pl.BlockSpec((L, 1, F_pad), lambda i: (0, 0, 0),
                             pipeline_mode=pl.Buffered(1)),
            ],
            out_specs=pl.BlockSpec((tile, F_pad), lambda i: (i, 0)),
        ),
        compiler_params=pltpu.CompilerParams(
            dimension_semantics=("parallel",),
            vmem_limit_bytes=vmem_limit,
        ),
        cost_estimate=cost,
    )(x_p, Vt, Wt, b2)

    return out[:B, :F]


def _reference(x, V, W, bias):
    x0 = x
    x_l = x0
    for layer in range(V.shape[0]):
        x_l_v = x_l @ V[layer].T
        x_l_w = x_l_v @ W[layer].T + bias[layer]
        x_l = x0 * x_l_w + x_l
    return x_l


if __name__ == "__main__":
    key = jax.random.PRNGKey(0)

    # ---- Test 1: toy config (in_features=128, low_rank=64, 3 layers, B=8),
    # f32 matmuls, tight tolerance. ----
    B, F, R, L = 8, 128, 64, 3
    k1, k2, k3, k4, key = jax.random.split(key, 5)
    x = jax.random.normal(k1, (B, F), dtype=jnp.float32)
    V = jax.random.normal(k2, (L, R, F), dtype=jnp.float32) * 0.05
    W = jax.random.normal(k3, (L, F, R), dtype=jnp.float32) * 0.05
    bias = jax.random.normal(k4, (L, F), dtype=jnp.float32) * 0.01

    out = jax.block_until_ready(
        low_rank_crossnet(x, V, W, bias, batch_tile=256,
                          matmul_dtype=jnp.float32))
    ref = _reference(x, V, W, bias)
    assert out.shape == (B, F)
    assert jnp.allclose(out, ref, atol=1e-4, rtol=1e-4)

    # ---- Test 2: ragged shapes (B not tile-aligned, F not a multiple of 128)
    # with bf16 matmul operands (f32 accumulation); looser tolerance. ----
    B2, F2, R2, L2 = 36, 96, 32, 3
    k1, k2, k3, k4, key = jax.random.split(key, 5)
    x2 = jax.random.normal(k1, (B2, F2), dtype=jnp.float32)
    V2 = jax.random.normal(k2, (L2, R2, F2), dtype=jnp.float32) * 0.05
    W2 = jax.random.normal(k3, (L2, F2, R2), dtype=jnp.float32) * 0.05
    b2 = jax.random.normal(k4, (L2, F2), dtype=jnp.float32) * 0.01

    out2 = jax.block_until_ready(
        low_rank_crossnet(x2, V2, W2, b2, batch_tile=128,
                          matmul_dtype=jnp.bfloat16))
    ref2 = _reference(x2, V2, W2, b2)
    assert out2.shape == (B2, F2)
    assert jnp.allclose(out2, ref2, atol=5e-2, rtol=5e-2)

    print("KERNEL_OK")
</pallas_src>

<mosaic_0001>
module attributes {stable_mosaic.version = 11 : i64} {
  func.func @kernel(%arg0: i32, %arg1: memref<8x128xf32, #tpu.memory_space<vmem>>, %arg2: memref<3x128x64xf32, #tpu.memory_space<vmem>>, %arg3: memref<3x64x128xf32, #tpu.memory_space<vmem>>, %arg4: memref<3x1x128xf32, #tpu.memory_space<vmem>>, %arg5: memref<8x128xf32, #tpu.memory_space<vmem>>) attributes {dimension_semantics = [#tpu.dimension_semantics<parallel>], iteration_bounds = array<i64: 1>, scalar_prefetch = 0 : i64, scratch_operands = 0 : i64, tpu.core_type = #tpu.core_type<tc>, window_params = [{transform_indices = @transform_0, window_bounds = array<i64: 8, 128>}, {pipeline_mode = #tpu.pipeline_mode<synchronous>, transform_indices = @transform_1, window_bounds = array<i64: 3, 128, 64>}, {pipeline_mode = #tpu.pipeline_mode<synchronous>, transform_indices = @transform_2, window_bounds = array<i64: 3, 64, 128>}, {pipeline_mode = #tpu.pipeline_mode<synchronous>, transform_indices = @transform_3, window_bounds = array<i64: 3, 1, 128>}, {transform_indices = @transform_4, window_bounds = array<i64: 8, 128>}]} {
    %c0 = arith.constant 0 : index
    %c0_0 = arith.constant 0 : index
    %0 = vector.load %arg1[%c0, %c0_0] : memref<8x128xf32, #tpu.memory_space<vmem>>, vector<8x128xf32>
    %c0_1 = arith.constant 0 : index
    %c0_2 = arith.constant 0 : index
    %c0_3 = arith.constant 0 : index
    %1 = vector.load %arg2[%c0_1, %c0_2, %c0_3] : memref<3x128x64xf32, #tpu.memory_space<vmem>>, vector<1x128x64xf32>
    %2 = vector.shape_cast %1 : vector<1x128x64xf32> to vector<128x64xf32>
    %c0_4 = arith.constant 0 : index
    %c0_5 = arith.constant 0 : index
    %c0_6 = arith.constant 0 : index
    %3 = vector.load %arg3[%c0_4, %c0_5, %c0_6] : memref<3x64x128xf32, #tpu.memory_space<vmem>>, vector<1x64x128xf32>
    %4 = vector.shape_cast %3 : vector<1x64x128xf32> to vector<64x128xf32>
    %c0_7 = arith.constant 0 : index
    %c0_8 = arith.constant 0 : index
    %c0_9 = arith.constant 0 : index
    %5 = vector.load %arg4[%c0_7, %c0_8, %c0_9] : memref<3x1x128xf32, #tpu.memory_space<vmem>>, vector<1x1x128xf32>
    %6 = vector.shape_cast %5 : vector<1x1x128xf32> to vector<1x128xf32>
    %cst = arith.constant dense<0.000000e+00> : vector<8x64xf32>
    %7 = tpu.matmul %0, %2, %cst {dimension_numbers = #tpu.dot_dimension_numbers<[1], [0], [0], [1], [0, 0, 1, 1], [], []>} : vector<8x128xf32>, vector<128x64xf32>, vector<8x64xf32> -> vector<8x64xf32>
    %cst_10 = arith.constant dense<0.000000e+00> : vector<8x128xf32>
    %8 = tpu.matmul %7, %4, %cst_10 {dimension_numbers = #tpu.dot_dimension_numbers<[1], [0], [0], [1], [0, 0, 1, 1], [], []>} : vector<8x64xf32>, vector<64x128xf32>, vector<8x128xf32> -> vector<8x128xf32>
    %9 = vector.broadcast %6 : vector<1x128xf32> to vector<8x128xf32>
    %10 = arith.addf %8, %9 : vector<8x128xf32>
    %11 = arith.mulf %0, %10 : vector<8x128xf32>
    %12 = arith.addf %11, %0 : vector<8x128xf32>
    %c1 = arith.constant 1 : index
    %c0_11 = arith.constant 0 : index
    %c0_12 = arith.constant 0 : index
    %13 = vector.load %arg2[%c1, %c0_11, %c0_12] : memref<3x128x64xf32, #tpu.memory_space<vmem>>, vector<1x128x64xf32>
    %14 = vector.shape_cast %13 : vector<1x128x64xf32> to vector<128x64xf32>
    %c1_13 = arith.constant 1 : index
    %c0_14 = arith.constant 0 : index
    %c0_15 = arith.constant 0 : index
    %15 = vector.load %arg3[%c1_13, %c0_14, %c0_15] : memref<3x64x128xf32, #tpu.memory_space<vmem>>, vector<1x64x128xf32>
    %16 = vector.shape_cast %15 : vector<1x64x128xf32> to vector<64x128xf32>
    %c1_16 = arith.constant 1 : index
    %c0_17 = arith.constant 0 : index
    %c0_18 = arith.constant 0 : index
    %17 = vector.load %arg4[%c1_16, %c0_17, %c0_18] : memref<3x1x128xf32, #tpu.memory_space<vmem>>, vector<1x1x128xf32>
    %18 = vector.shape_cast %17 : vector<1x1x128xf32> to vector<1x128xf32>
    %cst_19 = arith.constant dense<0.000000e+00> : vector<8x64xf32>
    %19 = tpu.matmul %12, %14, %cst_19 {dimension_numbers = #tpu.dot_dimension_numbers<[1], [0], [0], [1], [0, 0, 1, 1], [], []>} : vector<8x128xf32>, vector<128x64xf32>, vector<8x64xf32> -> vector<8x64xf32>
    %cst_20 = arith.constant dense<0.000000e+00> : vector<8x128xf32>
    %20 = tpu.matmul %19, %16, %cst_20 {dimension_numbers = #tpu.dot_dimension_numbers<[1], [0], [0], [1], [0, 0, 1, 1], [], []>} : vector<8x64xf32>, vector<64x128xf32>, vector<8x128xf32> -> vector<8x128xf32>
    %21 = vector.broadcast %18 : vector<1x128xf32> to vector<8x128xf32>
    %22 = arith.addf %20, %21 : vector<8x128xf32>
    %23 = arith.mulf %0, %22 : vector<8x128xf32>
    %24 = arith.addf %23, %12 : vector<8x128xf32>
    %c2 = arith.constant 2 : index
    %c0_21 = arith.constant 0 : index
    %c0_22 = arith.constant 0 : index
    %25 = vector.load %arg2[%c2, %c0_21, %c0_22] : memref<3x128x64xf32, #tpu.memory_space<vmem>>, vector<1x128x64xf32>
    %26 = vector.shape_cast %25 : vector<1x128x64xf32> to vector<128x64xf32>
    %c2_23 = arith.constant 2 : index
    %c0_24 = arith.constant 0 : index
    %c0_25 = arith.constant 0 : index
    %27 = vector.load %arg3[%c2_23, %c0_24, %c0_25] : memref<3x64x128xf32, #tpu.memory_space<vmem>>, vector<1x64x128xf32>
    %28 = vector.shape_cast %27 : vector<1x64x128xf32> to vector<64x128xf32>
    %c2_26 = arith.constant 2 : index
    %c0_27 = arith.constant 0 : index
    %c0_28 = arith.constant 0 : index
    %29 = vector.load %arg4[%c2_26, %c0_27, %c0_28] : memref<3x1x128xf32, #tpu.memory_space<vmem>>, vector<1x1x128xf32>
    %30 = vector.shape_cast %29 : vector<1x1x128xf32> to vector<1x128xf32>
    %cst_29 = arith.constant dense<0.000000e+00> : vector<8x64xf32>
    %31 = tpu.matmul %24, %26, %cst_29 {dimension_numbers = #tpu.dot_dimension_numbers<[1], [0], [0], [1], [0, 0, 1, 1], [], []>} : vector<8x128xf32>, vector<128x64xf32>, vector<8x64xf32> -> vector<8x64xf32>
    %cst_30 = arith.constant dense<0.000000e+00> : vector<8x128xf32>
    %32 = tpu.matmul %31, %28, %cst_30 {dimension_numbers = #tpu.dot_dimension_numbers<[1], [0], [0], [1], [0, 0, 1, 1], [], []>} : vector<8x64xf32>, vector<64x128xf32>, vector<8x128xf32> -> vector<8x128xf32>
    %33 = vector.broadcast %30 : vector<1x128xf32> to vector<8x128xf32>
    %34 = arith.addf %32, %33 : vector<8x128xf32>
    %35 = arith.mulf %0, %34 : vector<8x128xf32>
    %36 = arith.addf %35, %24 : vector<8x128xf32>
    %c0_31 = arith.constant 0 : index
    %c0_32 = arith.constant 0 : index
    %37 = vector.load %arg5[%c0_31, %c0_32] : memref<8x128xf32, #tpu.memory_space<vmem>>, vector<8x128xf32>
    tpu.vector_store %arg5[%c0_31, %c0_32], %36 {strides = array<i32>} : memref<8x128xf32, #tpu.memory_space<vmem>>, vector<8x128xf32>,
    return
  }
  func.func @transform_0(%arg0: i32) -> (i32, i32) {
    %c0_i32 = arith.constant 0 : i32
    %c0_i32_0 = arith.constant 0 : i32
    return %arg0, %c0_i32 : i32, i32
  }
  func.func @transform_1(%arg0: i32) -> (i32, i32, i32) {
    %c0_i32 = arith.constant 0 : i32
    %c0_i32_0 = arith.constant 0 : i32
    %c0_i32_1 = arith.constant 0 : i32
    %c0_i32_2 = arith.constant 0 : i32
    return %c0_i32, %c0_i32_0, %c0_i32_1 : i32, i32, i32
  }
  func.func @transform_2(%arg0: i32) -> (i32, i32, i32) {
    %c0_i32 = arith.constant 0 : i32
    %c0_i32_0 = arith.constant 0 : i32
    %c0_i32_1 = arith.constant 0 : i32
    %c0_i32_2 = arith.constant 0 : i32
    return %c0_i32, %c0_i32_0, %c0_i32_1 : i32, i32, i32
  }
  func.func @transform_3(%arg0: i32) -> (i32, i32, i32) {
    %c0_i32 = arith.constant 0 : i32
    %c0_i32_0 = arith.constant 0 : i32
    %c0_i32_1 = arith.constant 0 : i32
    %c0_i32_2 = arith.constant 0 : i32
    return %c0_i32, %c0_i32_0, %c0_i32_1 : i32, i32, i32
  }
  func.func @transform_4(%arg0: i32) -> (i32, i32) {
    %c0_i32 = arith.constant 0 : i32
    %c0_i32_0 = arith.constant 0 : i32
    return %arg0, %c0_i32 : i32, i32
  }
}

</mosaic_0001>

<bundles_post_ra>
// kernel: tpu_custom_call.1
= control target key start
LH: loop header
LB: loop body
LE: loop exit
PB: predicated region body
PF: predicated region fallthrough
CT: control target
= control target key end

     0   :  { %v1001_v3 = vmov 0.0|0.0   ;;  %vm1002_vm0 = vmmov 0   ;;  %v1003_v6 = vmov 0.0   ;;  %s1332_s0 = inlined_call_operand.vmem [shape: f32[8,128], index: 0, kind: input, shape index: {}]   ;;  %s1333_s1 = inlined_call_operand.vmem [shape: f32[3,128,64], index: 1, kind: input, shape index: {}]   ;;  %s1334_s2 = inlined_call_operand.vmem [shape: f32[3,64,128], index: 2, kind: input, shape index: {}]   ;;  %s1335_s3 = inlined_call_operand.vmem [shape: f32[3,1,128], index: 3, kind: input, shape index: {}]   ;;  %s1336_s4 = inlined_call_operand.hbm [shape: f32[8,128], index: 4, kind: output, shape index: {}]  }
   0x1   :  { %v19_v0 = vld [vmem:[%s1333_s1] sm:$0xff]  ;;  %v20_v1 = vld [vmem:[%s1333_s1 + $0x8] sm:$0xff]  ;;  %v21_v2 = vld [vmem:[%s1333_s1 + $0x10] sm:$0xff]  ;;  %865 = vmatprep.subr.bf16.mxu0 %v1001_v3  ;;  %735 = vmatprep.mubr.msk.f32.mxu0 %vm1002_vm0, %v1003_v6 }
   0x2   :  { %v866_v4 = vpack.c.bf16 %v20_v1, %v19_v0  ;;  %v22_v5 = vld [vmem:[%s1333_s1 + $0x18] sm:$0xff]  ;;  %889 = vmatprep.subr.bf16.mxu1 %v1001_v3  ;;  %754 = vmatprep.mubr.msk.f32.mxu1 %vm1002_vm0, %v1003_v6  ;;  %v23_v8 = vld [vmem:[%s1333_s1 + $0x20] sm:$0xff]  ;;  %v24_v9 = vld [vmem:[%s1333_s1 + $0x28] sm:$0xff] }
   0x3   :  { %v869_v7 = vpack.c.bf16 %v22_v5, %v21_v2  ;;  %v35_v10 = vld [vmem:[%s1334_s2] sm:$0xff]  ;;  %v36_v11 = vld [vmem:[%s1334_s2 + $0x8] sm:$0xff]  ;;  %v37_v12 = vld [vmem:[%s1334_s2 + $0x10] sm:$0xff]  ;;  %v872_v14 = vpack.c.bf16 %v24_v9, %v23_v8 }
   0x4   :  { %867 = vmatpush3.bf16.msra.mxu0 %v866_v4  ;;  %v38_v13 = vld [vmem:[%s1334_s2 + $0x18] sm:$0xff]  ;;  %v890_v15 = vpack.c.bf16 %v36_v11, %v35_v10  ;;  %v25_v16 = vld [vmem:[%s1333_s1 + $0x30] sm:$0xff] }
   0x5   :  { %868 = vmatprep.subr.bf16.mxu0 %v1001_v3  ;;  %v26_v17 = vld [vmem:[%s1333_s1 + $0x38] sm:$0xff] }
   0x8   :  { %870 = vmatpush3.bf16.msra.mxu0 %v869_v7 }
   0x9   :  { %871 = vmatprep.subr.bf16.mxu0 %v1001_v3 }
   0xa   :  { %9 = vsyncpa [#allocation3], 0  ;;  %891 = vmatpush3.bf16.msra.mxu1 %v890_v15  ;;  %v893_v18 = vpack.c.bf16 %v38_v13, %v37_v12  ;;  %v39_v19 = vld [vmem:[%s1334_s2 + $0x20] sm:$0xff]  ;;  %v40_v20 = vld [vmem:[%s1334_s2 + $0x28] sm:$0xff]  ;;  %v875_v21 = vpack.c.bf16 %v26_v17, %v25_v16  ;;  %vm120_vm1 = vcmask 523264   ;;  %s1004_s5 = smov [#allocation2]  }
   0xb   :  { %892 = vmatprep.subr.bf16.mxu1 %v1001_v3  ;;  %v27_v22 = vld [vmem:[%s1333_s1 + $0x40] sm:$0xff]  ;;  %v28_v23 = vld [vmem:[%s1333_s1 + $0x48] sm:$0xff]  ;;  %v896_v24 = vpack.c.bf16 %v40_v20, %v39_v19  ;;  %v41_v25 = vld [vmem:[%s1334_s2 + $0x30] sm:$0xff]  ;;  %s561_s6 = sshll.u32 %s1004_s5, 4  ;;  %s562_s6 = int_to_ptr.vmem [resolvable:$true] %s561_s6 }
   0xc   :  { %873 = vmatpush3.bf16.msra.mxu0 %v872_v14  ;;  %v42_v26 = vld [vmem:[%s1334_s2 + $0x38] sm:$0xff]  ;;  %v878_v27 = vpack.c.bf16 %v28_v23, %v27_v22  ;;  %v29_v28 = vld [vmem:[%s1333_s1 + $0x50] sm:$0xff]  ;;  %v31_v32 = vld [vmem:[%s1333_s1 + $0x60] sm:$0xff]  ;;  %s977_s7 = scalar_lea.vmem %s562_s6, 128  ;;  %p982_p1 = scmp.lt.s32.totalorder %s562_s6, %s562_s6 }
   0xd   :  { %874 = vmatprep.subr.bf16.mxu0 %v1001_v3  ;;  %v30_v29 = vld [vmem:[%s1333_s1 + $0x58] sm:$0xff]  ;;  %v899_v30 = vpack.c.bf16 %v42_v26, %v41_v25  ;;  %v32_v33 = vld [vmem:[%s1333_s1 + $0x68] sm:$0xff]  ;;  %v33_v35 = vld [vmem:[%s1333_s1 + $0x70] sm:$0xff]  ;;  %p978_p0 = scmp.ne.s32.totalorder %s562_s6, %s977_s7  ;;  %p983_p2 = scmp.lt.s32.totalorder %s977_s7, %s977_s7 }
   0xe   :  { %894 = vmatpush3.bf16.msra.mxu1 %v893_v18  ;;  %v881_v31 = vpack.c.bf16 %v30_v29, %v29_v28  ;;  %v884_v34 = vpack.c.bf16 %v32_v33, %v31_v32  ;;  %v34_v36 = vld [vmem:[%s1333_s1 + $0x78] sm:$0xff]  ;;  %v1122_v38 = vld [vmem:[%s1332_s0] sm:$0xff]  ;;  %v572_v40 = vld [vmem:[%s1333_s1 + $0x88] sm:$0xff] }
   0xf   :  { %895 = vmatprep.subr.bf16.mxu1 %v1001_v3  ;;  %v887_v37 = vpack.c.bf16 %v34_v36, %v33_v35  ;;  %v571_v39 = vld [vmem:[%s1333_s1 + $0x80] sm:$0xff]  ;;  %v573_v42 = vld [vmem:[%s1333_s1 + $0x90] sm:$0xff]  ;;  %v574_v43 = vld [vmem:[%s1333_s1 + $0x98] sm:$0xff]  ;;  %p984_p3 = por %p983_p2, %p982_p1 }
  0x10   :  { %876 = vmatpush3.bf16.msra.mxu0 %v875_v21  ;;  %v902_v41 = vpack.c.bf16 %v572_v40, %v571_v39  ;;  %v905_v46 = vpack.c.bf16 %v574_v43, %v573_v42  ;;  %v575_v47 = vld [vmem:[%s1333_s1 + $0xa0] sm:$0xff]  ;;  %v576_v48 = vld [vmem:[%s1333_s1 + $0xa8] sm:$0xff]  ;;  %v577_v50 = vld [vmem:[%s1333_s1 + $0xb0] sm:$0xff] }
  0x11   :  { %877 = vmatprep.subr.bf16.mxu0 %v1001_v3  ;;  %v908_v49 = vpack.c.bf16 %v576_v48, %v575_v47  ;;  %v578_v51 = vld [vmem:[%s1333_s1 + $0xb8] sm:$0xff]  ;;  %v579_v53 = vld [vmem:[%s1333_s1 + $0xc0] sm:$0xff]  ;;  %v580_v54 = vld [vmem:[%s1333_s1 + $0xc8] sm:$0xff]  ;;  %p985_p4 = pnand %p984_p3, %p978_p0 }
  0x12   :  { %897 = vmatpush3.bf16.msra.mxu1 %v896_v24  ;;  %v911_v52 = vpack.c.bf16 %v578_v51, %v577_v50  ;;  %v914_v55 = vpack.c.bf16 %v580_v54, %v579_v53  ;;  %v581_v56 = vld [vmem:[%s1333_s1 + $0xd0] sm:$0xff]  ;;  %v582_v57 = vld [vmem:[%s1333_s1 + $0xd8] sm:$0xff]  ;;  %v583_v59 = vld [vmem:[%s1333_s1 + $0xe0] sm:$0xff] }
  0x13   :  { %898 = vmatprep.subr.bf16.mxu1 %v1001_v3  ;;  %v917_v58 = vpack.c.bf16 %v582_v57, %v581_v56  ;;  %v584_v60 = vld [vmem:[%s1333_s1 + $0xe8] sm:$0xff]  ;;  %v585_v62 = vld [vmem:[%s1333_s1 + $0xf0] sm:$0xff]  ;;  %v586_v63 = vld [vmem:[%s1333_s1 + $0xf8] sm:$0xff] }
  0x14   :  { %879 = vmatpush3.bf16.msra.mxu0 %v878_v27  ;;  %v920_v61 = vpack.c.bf16 %v584_v60, %v583_v59  ;;  %v923_v0 = vpack.c.bf16 %v586_v63, %v585_v62  ;;  %v587_v1 = vld [vmem:[%s1334_s2 + $0x40] sm:$0xff]  ;;  %v588_v2 = vld [vmem:[%s1334_s2 + $0x48] sm:$0xff]  ;;  %v589_v4 = vld [vmem:[%s1334_s2 + $0x50] sm:$0xff] }
  0x15   :  { %880 = vmatprep.subr.bf16.mxu0 %v1001_v3  ;;  %v926_v5 = vpack.c.bf16 %v588_v2, %v587_v1  ;;  %v590_v7 = vld [vmem:[%s1334_s2 + $0x58] sm:$0xff]  ;;  %v591_v9 = vld [vmem:[%s1334_s2 + $0x60] sm:$0xff]  ;;  %v592_v10 = vld [vmem:[%s1334_s2 + $0x68] sm:$0xff] }
  0x16   :  { %900 = vmatpush3.bf16.msra.mxu1 %v899_v30  ;;  %v929_v8 = vpack.c.bf16 %v590_v7, %v589_v4  ;;  %v932_v11 = vpack.c.bf16 %v592_v10, %v591_v9  ;;  %v593_v12 = vld [vmem:[%s1334_s2 + $0x70] sm:$0xff]  ;;  %v594_v13 = vld [vmem:[%s1334_s2 + $0x78] sm:$0xff]  ;;  %v569_v15 = vld [vmem:[%s1335_s3] ss:$0 sm:$0xff] }
  0x17   :  { %901 = vmatprep.subr.bf16.mxu1 %v1001_v3  ;;  %v935_v14 = vpack.c.bf16 %v594_v13, %v593_v12  ;;  %v598_v21 = vld [vmem:[%s1333_s1 + $0x100] sm:$0xff]  ;;  %v599_v22 = vld [vmem:[%s1333_s1 + $0x108] sm:$0xff]  ;;  %v600_v24 = vld [vmem:[%s1333_s1 + $0x110] sm:$0xff] }
  0x18   :  { %882 = vmatpush3.bf16.msra.mxu0 %v881_v31  ;;  %v938_v23 = vpack.c.bf16 %v599_v22, %v598_v21  ;;  %v601_v25 = vld [vmem:[%s1333_s1 + $0x118] sm:$0xff]  ;;  %v602_v29 = vld [vmem:[%s1333_s1 + $0x120] sm:$0xff]  ;;  %v603_v30 = vld [vmem:[%s1333_s1 + $0x128] sm:$0xff] }
  0x19   :  { %883 = vmatprep.subr.bf16.mxu0 %v1001_v3  ;;  %v941_v28 = vpack.c.bf16 %v601_v25, %v600_v24  ;;  %v944_v31 = vpack.c.bf16 %v603_v30, %v602_v29  ;;  %v604_v32 = vld [vmem:[%s1333_s1 + $0x130] sm:$0xff]  ;;  %v607_v35 = vld [vmem:[%s1333_s1 + $0x148] sm:$0xff]  ;;  %v609_v39 = vld [vmem:[%s1333_s1 + $0x158] sm:$0xff] }
  0x1a   :  { %v611_v42 = vld [vmem:[%s1333_s1 + $0x168] sm:$0xff]  ;;  %v614_v47 = vld [vmem:[%s1334_s2 + $0x80] sm:$0xff]  ;;  %v617_v51 = vld [vmem:[%s1334_s2 + $0x98] sm:$0xff] }
  0x1b   :  { %v615_v48 = vld [vmem:[%s1334_s2 + $0x88] sm:$0xff]  ;;  %v618_v53 = vld [vmem:[%s1334_s2 + $0xa0] sm:$0xff]  ;;  %v620_v56 = vld [vmem:[%s1334_s2 + $0xb0] sm:$0xff] }
  0x1c   :  { %885 = vmatpush3.bf16.msra.mxu0 %v884_v34  ;;  %v606_v34 = vld [vmem:[%s1333_s1 + $0x140] sm:$0xff]  ;;  %v962_v50 = vpack.c.bf16 %v615_v48, %v614_v47  ;;  %v619_v54 = vld [vmem:[%s1334_s2 + $0xa8] sm:$0xff]  ;;  %v621_v57 = vld [vmem:[%s1334_s2 + $0xb8] sm:$0xff] }
  0x1d   :  { %886 = vmatprep.subr.bf16.mxu0 %v1001_v3  ;;  %v950_v36 = vpack.c.bf16 %v607_v35, %v606_v34  ;;  %v596_v59 = vld [vmem:[%s1335_s3 + $0x1] ss:$0 sm:$0xff] }
  0x20   :  { %888 = vmatpush3.bf16.msra.mxu0 %v887_v37  ;;  %v608_v37 = vld [vmem:[%s1333_s1 + $0x150] sm:$0xff] }
  0x21   :  { %925 = vmatprep.subr.bf16.mxu0 %v1001_v3  ;;  %v953_v40 = vpack.c.bf16 %v609_v39, %v608_v37 }
  0x23   :  { %736 = vmatmul.mubr.f32.vlgmr.msra.gmra.mrb[0].mxu0 %v1122_v38 }
  0x24   :  { %808 = vmatprep.mubr.msk.f32.mxu0 %vm1002_vm0, %v1003_v6  ;;  %927 = vmatpush3.bf16.msra.mxu0 %v926_v5 }
  0x25   :  { %928 = vmatprep.subr.bf16.mxu0 %v1001_v3 }
  0x28   :  { %930 = vmatpush3.bf16.msra.mxu0 %v929_v8 }
  0x29   :  { %931 = vmatprep.subr.bf16.mxu0 %v1001_v3 }
  0x2c   :  { %933 = vmatpush3.bf16.msra.mxu0 %v932_v11 }
  0x2d   :  { %934 = vmatprep.subr.bf16.mxu0 %v1001_v3 }
  0x30   :  { %936 = vmatpush3.bf16.msra.mxu0 %v935_v14 }
  0x31   :  { %937 = vmatprep.subr.bf16.mxu0 %v1001_v3 }
  0xf6   :  { %v110_v44 = vpop.f32.mrb[0].mxu0 }
  0xf7   :  { %v737_v45 = vpop.f32.mrb[1].mxu0  ;;  %755 = vmatmul.mubr.msk.f32.vlgmr.msra.gmra.mrb[0].mxu1 %vm120_vm1, %v110_v44  ;;  %v612_v44 = vld [vmem:[%s1333_s1 + $0x170] sm:$0xff] }
  0xf8   :  { %903 = vmatpush3.bf16.msra.mxu1 %v902_v41  ;;  %789 = vmatprep.mubr.msk.f32.mxu1 %vm1002_vm0, %v1003_v6  ;;  %v610_v41 = vld [vmem:[%s1333_s1 + $0x160] sm:$0xff]  ;;  %v613_v45 = vld [vmem:[%s1333_s1 + $0x178] sm:$0xff] }
  0xf9   :  { %904 = vmatprep.subr.bf16.mxu1 %v1001_v3  ;;  %v956_v43 = vpack.c.bf16 %v611_v42, %v610_v41 }
  0xfc   :  { %906 = vmatpush3.bf16.msra.mxu1 %v905_v46  ;;  %v959_v46 = vpack.c.bf16 %v613_v45, %v612_v44 }
  0xfd   :  { %907 = vmatprep.subr.bf16.mxu1 %v1001_v3 }
 0x100   :  { %909 = vmatpush3.bf16.msra.mxu1 %v908_v49  ;;  %v616_v49 = vld [vmem:[%s1334_s2 + $0x90] sm:$0xff] }
 0x101   :  { %910 = vmatprep.subr.bf16.mxu1 %v1001_v3 }
 0x104   :  { %912 = vmatpush3.bf16.msra.mxu1 %v911_v52  ;;  %v965_v52 = vpack.c.bf16 %v617_v51, %v616_v49 }
 0x105   :  { %913 = vmatprep.subr.bf16.mxu1 %v1001_v3 }
 0x108   :  { %915 = vmatpush3.bf16.msra.mxu1 %v914_v55  ;;  %v968_v55 = vpack.c.bf16 %v619_v54, %v618_v53 }
 0x109   :  { %916 = vmatprep.subr.bf16.mxu1 %v1001_v3 }
 0x10c   :  { %918 = vmatpush3.bf16.msra.mxu1 %v917_v58  ;;  %v971_v58 = vpack.c.bf16 %v621_v57, %v620_v56 }
 0x10d   :  { %919 = vmatprep.subr.bf16.mxu1 %v1001_v3 }
 0x110   :  { %921 = vmatpush3.bf16.msra.mxu1 %v920_v61 }
 0x111   :  { %922 = vmatprep.subr.bf16.mxu1 %v1001_v3 }
 0x114   :  { %924 = vmatpush3.bf16.msra.mxu1 %v923_v0 }
 0x115   :  { %961 = vmatprep.subr.bf16.mxu1 %v1001_v3 }
 0x1ca   :  { %v190_v16 = vpop.f32.mrb[0].mxu1 }
 0x1cb   :  { %v191_v17 = vadd.f32 %v569_v15, %v190_v16  ;;  %v756_v18 = vpop.f32.mrb[1].mxu1 }
 0x1cd   :  { %v194_v19 = vmul.f32 %v191_v17, %v1122_v38 }
 0x1cf   :  { %v1220_v20 = vadd.f32 %v194_v19, %v1122_v38 }
 0x1d1   :  { %790 = vmatmul.mubr.f32.vlgmr.msra.gmra.mrb[2].mxu1 %v1220_v20 }
 0x1d2   :  { %862 = vmatprep.mubr.msk.f32.mxu1 %vm1002_vm0, %v1003_v6  ;;  %963 = vmatpush3.bf16.msra.mxu1 %v962_v50 }
 0x1d3   :  { %964 = vmatprep.subr.bf16.mxu1 %v1001_v3 }
 0x1d6   :  { %966 = vmatpush3.bf16.msra.mxu1 %v965_v52 }
 0x1d7   :  { %967 = vmatprep.subr.bf16.mxu1 %v1001_v3 }
 0x1da   :  { %969 = vmatpush3.bf16.msra.mxu1 %v968_v55 }
 0x1db   :  { %970 = vmatprep.subr.bf16.mxu1 %v1001_v3 }
 0x1de   :  { %972 = vmatpush3.bf16.msra.mxu1 %v971_v58 }
 0x2a4   :  { %v290_v26 = vpop.f32.mrb[2].mxu1 }
 0x2a5   :  { %v791_v27 = vpop.f32.mrb[3].mxu1  ;;  %809 = vmatmul.mubr.msk.f32.vlgmr.msra.gmra.mrb[2].mxu0 %vm120_vm1, %v290_v26 }
 0x2a6   :  { %939 = vmatpush3.bf16.msra.mxu0 %v938_v23  ;;  %843 = vmatprep.mubr.msk.f32.mxu0 %vm1002_vm0, %v1003_v6  ;;  %v605_v6 = vld [vmem:[%s1333_s1 + $0x138] sm:$0xff] }
 0x2a7   :  { %940 = vmatprep.subr.bf16.mxu0 %v1001_v3  ;;  %v947_v33 = vpack.c.bf16 %v605_v6, %v604_v32 }
 0x2aa   :  { %942 = vmatpush3.bf16.msra.mxu0 %v941_v28 }
 0x2ab   :  { %943 = vmatprep.subr.bf16.mxu0 %v1001_v3 }
 0x2ae   :  { %945 = vmatpush3.bf16.msra.mxu0 %v944_v31 }
 0x2af   :  { %946 = vmatprep.subr.bf16.mxu0 %v1001_v3 }
 0x2b2   :  { %948 = vmatpush3.bf16.msra.mxu0 %v947_v33 }
 0x2b3   :  { %949 = vmatprep.subr.bf16.mxu0 %v1001_v3 }
 0x2b6   :  { %951 = vmatpush3.bf16.msra.mxu0 %v950_v36 }
 0x2b7   :  { %952 = vmatprep.subr.bf16.mxu0 %v1001_v3 }
 0x2ba   :  { %954 = vmatpush3.bf16.msra.mxu0 %v953_v40 }
 0x2bb   :  { %955 = vmatprep.subr.bf16.mxu0 %v1001_v3 }
 0x2be   :  { %957 = vmatpush3.bf16.msra.mxu0 %v956_v43 }
 0x2bf   :  { %958 = vmatprep.subr.bf16.mxu0 %v1001_v3  ;;  %v623_v3 = vld [vmem:[%s1335_s3 + $0x2] ss:$0 sm:$0xff] }
 0x2c2   :  { %960 = vmatpush3.bf16.msra.mxu0 %v959_v46 }
 0x378   :  { %v369_v60 = vpop.f32.mrb[2].mxu0 }
 0x379   :  { %v370_v61 = vadd.f32 %v596_v59, %v369_v60  ;;  %v810_v62 = vpop.f32.mrb[3].mxu0 }
 0x37b   :  { %v373_v63 = vmul.f32 %v370_v61, %v1122_v38 }
 0x37d   :  { %v374_v0 = vadd.f32 %v373_v63, %v1220_v20 }
 0x37f   :  { %844 = vmatmul.mubr.f32.vlgmr.msra.gmra.mrb[4].mxu0 %v374_v0 }
 0x452   :  { %v469_v1 = vpop.f32.mrb[4].mxu0 }
 0x453   :  { %v845_v2 = vpop.f32.mrb[5].mxu0  ;;  %863 = vmatmul.mubr.msk.f32.vlgmr.msra.gmra.mrb[4].mxu1 %vm120_vm1, %v469_v1 }
 0x526   :  { %v548_v4 = vpop.f32.mrb[4].mxu1 }
 0x527   :  { %v549_v5 = vadd.f32 %v623_v3, %v548_v4  ;;  %v864_v7 = vpop.f32.mrb[5].mxu1 }
 0x529   :  { %v552_v8 = vmul.f32 %v549_v5, %v1122_v38 }
 0x52b   :  { %v553_v9 = vadd.f32 %v552_v8, %v374_v0 }
 0x52d   :  { %554 = vst [vmem:[#allocation2] sm:$0xff] %v553_v9 }
 0x52e   :  { %988 = shalt.err (!%p985_p4)
}
 0x52f   :  { %s989_s3 = scalar_lea.hbm %s1336_s4, 128 }
 0x530   :  { %p990_p5 = scmp.ne.s32.totalorder %s1336_s4, %s989_s3  ;;  %p993_p6 = scmp.lt.u32.totalorder %s989_s3, %s1336_s4 }
 0x532   :  { %p995_p7 = pnand %p993_p6, %p990_p5 }
 0x534   :  { %998 = shalt.err (!%p995_p7)
}
 0x535   :  { %564 = dma.vmem_to_hbm [thread:$0]  %s562_s6, 128, %s1336_s4, [#allocation3]  }
 0x536   :  { %999 = dma.done.wait [#allocation3], 128  }
 0x537   :  { %1000 = vsyncadd [#allocation3], 4294967168 }
 0x538   :  { %568 = vsyncpa [#allocation3], 1 }

</bundles_post_ra>
